<compile_context>
chip_gen: v7x
topology: tpu7x:2x2x1
jax: 0.10.0
libtpu: 0.0.40
codegen_flags: <defaults>
</compile_context>

<pallas_src>
import jax
import jax.numpy as jnp
from jax.experimental import pallas as pl
from jax.experimental.pallas import tpu as pltpu


def _make_kernel(B, S, TB):
    """Kernel gathering TB last-valid hidden rows via manual DMA and applying the value head."""

    def kernel(lens_ref, h_hbm, w_ref, out_ref, hrow_vmem, sem):
        # lens_ref  : int32[B] in SMEM (scalar prefetch) -- last-valid-token index per batch elem
        # h_hbm     : (B*S, H) ref left in HBM (memory_space=pl.ANY)
        # w_ref     : (1, H) f32 value-head weight, resident in VMEM
        # out_ref   : (1, 1, TB) f32 lane-dense output block
        # hrow_vmem : (TB, H) VMEM scratch (hidden dtype)
        # sem       : DMA semaphores, shape (TB,)
        tile = pl.program_id(0)
        base = tile * TB

        # Front-load every SMEM scalar read and DMA start before the first .wait()
        # (.wait() breaks SMEM sst->sld forwarding and would stall later scalar loads).
        for t in range(TB):
            b = jnp.minimum(base + t, B - 1)          # clamp padded tail slots to a valid row
            row = b * S + lens_ref[b]                 # flat row index of the last valid token
            pltpu.make_async_copy(h_hbm.at[row], hrow_vmem.at[t], sem.at[t]).start()
        for t in range(TB):
            pltpu.make_async_copy(h_hbm.at[0], hrow_vmem.at[t], sem.at[t]).wait()

        # VPU multiply + XLU lane reduce; an N=1 MXU matmul would waste 127/255 columns.
        h = hrow_vmem[...].astype(jnp.float32)        # single bf16->f32 cast, (TB, H)
        w = w_ref[...]                                # (1, H), already f32
        r = jnp.sum(h * w, axis=-1)                   # (TB,)
        out_ref[...] = r.reshape(1, 1, TB)            # lane-dense store of TB rewards

    return kernel


def _pick_tb(B):
    # Sublane-dense tiles (16 rows covers packed bf16 sublanes; 8 for f32) while keeping the
    # grid length >= 2 so v7x's two TensorCores both get work.  No-op concern on v5e/v6e.
    tb = 16
    while tb > 1 and pl.cdiv(B, tb) < 2:
        tb //= 2
    return tb


def reward_model_head(hidden_states, attention_mask, value_head_w):
    """hidden_states [B,S,H] (f32 or bf16), attention_mask [B,S], value_head_w [1,H] -> rewards [B] f32."""
    B, S, H = hidden_states.shape
    assert value_head_w.shape == (1, H)

    # Length reduction belongs in the wrapper (tiny XLA reduce), not in VMEM.
    # NOTE: assumes right-padded (contiguous-prefix) masks, same as the PyTorch module.
    seq_last = jnp.sum(attention_mask.astype(jnp.int32), axis=1) - 1
    seq_last = jnp.where(seq_last < 0, S - 1, seq_last).astype(jnp.int32)  # wrap like torch [-1]

    TB = _pick_tb(B)
    n_tiles = pl.cdiv(B, TB)

    # Flatten so the row gather is a single dynamic leading index (paged-attention DMA pattern).
    h_flat = hidden_states.reshape(B * S, H)
    # Tiny (1, H) weight: cast once here so the resident block needs no per-step cast in-kernel.
    w_f32 = value_head_w.astype(jnp.float32)

    # VMEM budget from the actual buffers (scratch + double-buffered weight & output tiles).
    itemsize = jnp.dtype(hidden_states.dtype).itemsize
    h_pad = pl.cdiv(H, 128) * 128
    scratch_bytes = pl.cdiv(TB, 8) * 8 * h_pad * itemsize
    weight_bytes = 2 * 8 * h_pad * 4
    out_bytes = 2 * 8 * (pl.cdiv(TB, 128) * 128) * 4
    vmem_limit = int(min(max(1 << 20, 4 * (scratch_bytes + weight_bytes + out_bytes)),
                         32 * 1024 * 1024))

    out = pl.pallas_call(
        _make_kernel(B, S, TB),
        out_shape=jax.ShapeDtypeStruct((n_tiles, 1, TB), jnp.float32),
        grid_spec=pltpu.PrefetchScalarGridSpec(
            num_scalar_prefetch=1,
            grid=(n_tiles,),
            in_specs=[
                # Hidden states stay in HBM; rows are gathered manually inside the kernel.
                pl.BlockSpec(memory_space=pl.ANY),
                # Value-head weight, resident (constant block index -> fetched once).
                pl.BlockSpec((1, H), lambda i, lens: (0, 0)),
            ],
            out_specs=pl.BlockSpec((1, 1, TB), lambda i, lens: (i, 0, 0)),
            scratch_shapes=[
                pltpu.VMEM((TB, H), hidden_states.dtype),
                pltpu.SemaphoreType.DMA((TB,)),
            ],
        ),
        compiler_params=pltpu.CompilerParams(
            # Batch tiles are fully independent -> shard across TensorCores on v7x.
            dimension_semantics=("parallel",),
            vmem_limit_bytes=vmem_limit,
        ),
    )(seq_last, h_flat, w_f32)

    # Padded tail slots (B % TB != 0) hold duplicated last-row rewards; drop them.
    return out.reshape(n_tiles * TB)[:B]


def _reference(hidden_states, attention_mask, value_head_w):
    S = hidden_states.shape[1]
    seq_lengths = jnp.sum(attention_mask.astype(jnp.int32), axis=1) - 1
    seq_lengths = jnp.where(seq_lengths < 0, S - 1, seq_lengths)
    batch_idx = jnp.arange(hidden_states.shape[0])
    last_hidden = hidden_states[batch_idx, seq_lengths, :].astype(jnp.float32)   # (B, H)
    return last_hidden @ value_head_w[0].astype(jnp.float32)                     # (B,)


if __name__ == "__main__":
    # TODO(synk): the base_model (AutoModelForCausalLM) transformer forward is not reimplemented;
    # its final hidden states are synthesized deterministically here.
    B, S, H = 2, 8, 32
    key = jax.random.PRNGKey(0)
    k_h, k_w = jax.random.split(key)

    hidden_states = jax.random.normal(k_h, (B, S, H), dtype=jnp.float32)

    # Right-padded attention mask with ragged valid lengths (8 and 5 valid tokens).
    lengths = jnp.array([8, 5], dtype=jnp.int32)
    attention_mask = (jnp.arange(S)[None, :] < lengths[:, None]).astype(jnp.int32)

    # nn.Linear(hidden_size, 1, bias=False).weight has shape (1, H).
    value_head_w = jax.random.normal(k_w, (1, H), dtype=jnp.float32) * 0.02

    # f32 path
    rewards = reward_model_head(hidden_states, attention_mask, value_head_w)
    rewards = jax.block_until_ready(rewards)
    ref = _reference(hidden_states, attention_mask, value_head_w)
    assert rewards.shape == (B,)
    assert jnp.allclose(rewards, ref, atol=1e-5, rtol=1e-5), (rewards, ref)

    # bf16 hidden states (realistic base-LM dtype); accumulation stays f32 in-kernel.
    h_bf16 = hidden_states.astype(jnp.bfloat16)
    rewards_bf16 = jax.block_until_ready(
        reward_model_head(h_bf16, attention_mask, value_head_w)
    )
    ref_bf16 = _reference(h_bf16, attention_mask, value_head_w)
    assert jnp.allclose(rewards_bf16, ref_bf16, atol=1e-2, rtol=1e-2), (rewards_bf16, ref_bf16)

    print("KERNEL_OK")
</pallas_src>

<mosaic_0001>
module attributes {stable_mosaic.version = 11 : i64} {
  func.func @kernel(%arg0: i32, %arg1: memref<2xi32, #tpu.memory_space<smem>>, %arg2: memref<16x32xf32, #tpu.memory_space<any>>, %arg3: memref<1x32xf32, #tpu.memory_space<vmem>>, %arg4: memref<1x1x1xf32, #tpu.memory_space<vmem>>, %arg5: memref<1x32xf32, #tpu.memory_space<vmem>>, %arg6: memref<1x!tpu.dma_semaphore, #tpu.memory_space<semaphore_mem>>) attributes {dimension_semantics = [#tpu.dimension_semantics<parallel>], iteration_bounds = array<i64: 2>, scalar_prefetch = 1 : i64, scratch_operands = 2 : i64, tpu.core_type = #tpu.core_type<tc>, window_params = [{}, {pipeline_mode = #tpu.pipeline_mode<synchronous>, transform_indices = @transform_1, window_bounds = array<i64: 1, 32>}, {transform_indices = @transform_2, window_bounds = array<i64: 1, 1, 1>}]} {
    %c1_i32 = arith.constant 1 : i32
    %0 = arith.muli %arg0, %c1_i32 : i32
    %c0_i32 = arith.constant 0 : i32
    %1 = arith.addi %0, %c0_i32 : i32
    %c1_i32_0 = arith.constant 1 : i32
    %2 = arith.minsi %1, %c1_i32_0 : i32
    %c8_i32 = arith.constant 8 : i32
    %3 = arith.muli %2, %c8_i32 : i32
    %4 = arith.index_cast %2 : i32 to index
    %5 = memref.load %arg1[%4] : memref<2xi32, #tpu.memory_space<smem>>
    %6 = arith.addi %3, %5 : i32
    %c0_i32_1 = arith.constant 0 : i32
    %c0_i32_2 = arith.constant 0 : i32
    %c0_i32_3 = arith.constant 0 : i32
    %7 = tpu.memref_slice %arg2[%6, %c0_i32_3] : memref<16x32xf32, #tpu.memory_space<any>> -> memref<1x32xf32, #tpu.memory_space<any>>
    %8 = tpu.memref_squeeze %7 : memref<1x32xf32, #tpu.memory_space<any>> -> memref<32xf32, #tpu.memory_space<any>>
    %c0_i32_4 = arith.constant 0 : i32
    %9 = tpu.memref_slice %arg5[%c0_i32_1, %c0_i32_4] : memref<1x32xf32, #tpu.memory_space<vmem>> -> memref<1x32xf32, #tpu.memory_space<vmem>>
    %10 = tpu.memref_squeeze %9 : memref<1x32xf32, #tpu.memory_space<vmem>> -> memref<32xf32, #tpu.memory_space<vmem>>
    %11 = tpu.memref_slice %arg6[%c0_i32_2] : memref<1x!tpu.dma_semaphore, #tpu.memory_space<semaphore_mem>> -> memref<1x!tpu.dma_semaphore, #tpu.memory_space<semaphore_mem>>
    %12 = tpu.memref_squeeze %11 : memref<1x!tpu.dma_semaphore, #tpu.memory_space<semaphore_mem>> -> memref<!tpu.dma_semaphore, #tpu.memory_space<semaphore_mem>>
    tpu.enqueue_dma source(%8 : memref<32xf32, #tpu.memory_space<any>>) target(%10 : memref<32xf32, #tpu.memory_space<vmem>>) target_semaphore(%12 : memref<!tpu.dma_semaphore, #tpu.memory_space<semaphore_mem>>)
    %c0_i32_5 = arith.constant 0 : i32
    %c0_i32_6 = arith.constant 0 : i32
    %c0_i32_7 = arith.constant 0 : i32
    %c0_i32_8 = arith.constant 0 : i32
    %13 = tpu.memref_slice %arg2[%c0_i32_5, %c0_i32_8] : memref<16x32xf32, #tpu.memory_space<any>> -> memref<1x32xf32, #tpu.memory_space<any>>
    %14 = tpu.memref_squeeze %13 : memref<1x32xf32, #tpu.memory_space<any>> -> memref<32xf32, #tpu.memory_space<any>>
    %c0_i32_9 = arith.constant 0 : i32
    %15 = tpu.memref_slice %arg5[%c0_i32_6, %c0_i32_9] : memref<1x32xf32, #tpu.memory_space<vmem>> -> memref<1x32xf32, #tpu.memory_space<vmem>>
    %16 = tpu.memref_squeeze %15 : memref<1x32xf32, #tpu.memory_space<vmem>> -> memref<32xf32, #tpu.memory_space<vmem>>
    %17 = tpu.memref_slice %arg6[%c0_i32_7] : memref<1x!tpu.dma_semaphore, #tpu.memory_space<semaphore_mem>> -> memref<1x!tpu.dma_semaphore, #tpu.memory_space<semaphore_mem>>
    %18 = tpu.memref_squeeze %17 : memref<1x!tpu.dma_semaphore, #tpu.memory_space<semaphore_mem>> -> memref<!tpu.dma_semaphore, #tpu.memory_space<semaphore_mem>>
    tpu.wait_dma2 semaphore(%18 : memref<!tpu.dma_semaphore, #tpu.memory_space<semaphore_mem>>) src(%14 : memref<32xf32, #tpu.memory_space<any>>) dst(%16 : memref<32xf32, #tpu.memory_space<vmem>>)
    %c0 = arith.constant 0 : index
    %c0_10 = arith.constant 0 : index
    %19 = vector.load %arg5[%c0, %c0_10] : memref<1x32xf32, #tpu.memory_space<vmem>>, vector<1x32xf32>
    %c0_11 = arith.constant 0 : index
    %c0_12 = arith.constant 0 : index
    %20 = vector.load %arg3[%c0_11, %c0_12] : memref<1x32xf32, #tpu.memory_space<vmem>>, vector<1x32xf32>
    %21 = arith.mulf %19, %20 : vector<1x32xf32>
    %cst = arith.constant dense<0.000000e+00> : vector<1xf32>
    %22 = vector.multi_reduction <add>, %21, %cst [1] : vector<1x32xf32> to vector<1xf32>
    %23 = vector.shape_cast %22 : vector<1xf32> to vector<1x1x1xf32>
    %c0_13 = arith.constant 0 : index
    %c0_14 = arith.constant 0 : index
    %c0_15 = arith.constant 0 : index
    %24 = vector.load %arg4[%c0_13, %c0_14, %c0_15] : memref<1x1x1xf32, #tpu.memory_space<vmem>>, vector<1x1x1xf32>
    tpu.vector_store %arg4[%c0_13, %c0_14, %c0_15], %23 {strides = array<i32>} : memref<1x1x1xf32, #tpu.memory_space<vmem>>, vector<1x1x1xf32>,
    return
  }
  func.func @transform_1(%arg0: i32, %arg1: memref<2xi32, #tpu.memory_space<smem>>) -> (i32, i32) {
    %c0_i32 = arith.constant 0 : i32
    %c0_i32_0 = arith.constant 0 : i32
    %c0_i32_1 = arith.constant 0 : i32
    return %c0_i32, %c0_i32_0 : i32, i32
  }
  func.func @transform_2(%arg0: i32, %arg1: memref<2xi32, #tpu.memory_space<smem>>) -> (i32, i32, i32) {
    %c0_i32 = arith.constant 0 : i32
    %c0_i32_0 = arith.constant 0 : i32
    %c0_i32_1 = arith.constant 0 : i32
    return %arg0, %c0_i32, %c0_i32_0 : i32, i32, i32
  }
}

</mosaic_0001>

<bundles_post_ra>
// kernel: tpu_custom_call.1
= control target key start
LH: loop header
LB: loop body
LE: loop exit
PB: predicated region body
PF: predicated region fallthrough
CT: control target
= control target key end

     0   :  { %s308_s0 = inlined_call_operand.hbm [shape: s32[2], index: 0, kind: input, shape index: {}]   ;;  %s309_s1 = inlined_call_operand.hbm [shape: f32[16,32], index: 1, kind: input, shape index: {}]   ;;  %s310_s2 = inlined_call_operand.vmem [shape: f32[1,32], index: 2, kind: input, shape index: {}]   ;;  %s311_s3 = inlined_call_operand.vmem [shape: f32[2,1,1], index: 3, kind: output, shape index: {}]  }
   0x1   :  { %s192_s14 = scalar_lea.hbm %s308_s0, 16 }
   0x2   :  { %p193_p0 = scmp.ne.s32.totalorder %s308_s0, %s192_s14  ;;  %p196_p1 = scmp.lt.u32.totalorder %s192_s14, %s308_s0 }
   0x4   :  { %p198_p2 = pnand %p196_p1, %p193_p0 }
   0x6   :  { %201 = shalt.err (!%p198_p2)  }
   0x7   :  { %s238_s19 = smov [#allocation5]  }
   0x8   :  { %9 = dma.hbm_to_smem %s308_s0, 16, %s238_s19, [#allocation4] }
   0x9   :  { %230 = dma.done.wait [#allocation4], 16 }
   0xa   :  { %231 = vsyncadd [#allocation4], 4294967280 }
   0xb   :  { %11 = sfence }
   0xc   :  { %s272_s22 = smov 0  }
   0xd LB: > { %s173_s23 = sadd.s32 4294967295, %s236_s22   ;;  %p176_p3 = scmp.ge.s32.totalorder %s236_s22, 1  ;;  %s236_s22 = sphi %s272_s22, %s17_s22  }
   0xe   : > { %p83_p4 = scmp.lt.s32.totalorder %s236_s22, 3 }
  0x10   : > { %p84_p5 = pnand %p176_p3, %p83_p4 }
  0x11   : > { %p96_p6 = scmp.lt.s32.totalorder (!%p84_p5), %s173_s23, 1  ;;  %s239_s28 = smov (!%p84_p5), [#allocation2]  }
  0x12   : > { %87 = sbr.rel (%p84_p5) target bundleno = 202 (0xca), region = 24  ;;  %s113_s29 = sshll.u32 (!%p84_p5), %s239_s28, 4  ;;  %s114_s29 = int_to_ptr.vmem [resolvable:$true] %s113_s29 }
  0x13   : > { %s204_s11 = scalar_lea.hbm (!%p84_p5), %s309_s1, 256 }
  0x19   : > { %s313_s23 = smov (!%p96_p6, %s173_s23), 1 }
  0x1a   : > { %s98_s25 = scalar_lea.vmem %s311_s3, %s313_s23  ;;  %s102_s26 = sld [smem:[#allocation5 + %s313_s23]] }
  0x1b   : > { %s177_s27 = sshll.u32 %s313_s23, 3 }
  0x20   : > { %s103_s30 = sadd.s32 %s177_s27, %s102_s26 }
  0x21   : > { %s178_s4 = sshll.u32 %s103_s30, 4 }
  0x22   : > { %s105_s7 = scalar_lea.hbm %s309_s1, %s178_s4 }
  0x23   : > { %s202_s8 = scalar_lea.hbm %s105_s7, 16  ;;  %p205_p8 = scmp.lt.u32.totalorder %s105_s7, %s309_s1 }
  0x24   : > { %p203_p7 = scmp.ne.s32.totalorder %s105_s7, %s202_s8  ;;  %p206_p9 = scmp.lt.u32.totalorder %s204_s11, %s202_s8 }
  0x25   : > { %p208_p11 = scmp.lt.u32.totalorder %s202_s8, %s105_s7 }
  0x26   : > { %p207_p10 = por %p206_p9, %p205_p8 }
  0x28   : > { %p209_p12 = por %p208_p11, %p207_p10 }
  0x2a   : > { %p210_p13 = pnand %p209_p12, %p203_p7 }
  0x2c   : > { %213 = shalt.err (!%p210_p13)  }
  0x2d   : > { %s214_s14 = scalar_lea.vmem %s114_s29, 16  ;;  %p219_p1 = scmp.lt.s32.totalorder %s114_s29, %s114_s29 }
  0x2e   : > { %p215_p0 = scmp.ne.s32.totalorder %s114_s29, %s214_s14  ;;  %p220_p2 = scmp.lt.s32.totalorder %s214_s14, %s214_s14 }
  0x30   : > { %p221_p3 = por %p220_p2, %p219_p1 }
  0x32   : > { %p222_p4 = pnand %p221_p3, %p215_p0 }
  0x34   : > { %225 = shalt.err (!%p222_p4)  }
  0x35   : > { %116 = dma.hbm_to_vmem [thread:$0]  %s105_s7, 16, %s114_s29, [#allocation3] }
  0x36   : > { %232 = dma.done.wait [#allocation3], 16 }
  0x37   : > { %233 = vsyncadd [#allocation3], 4294967280  ;;  %v119_v0 = vld [vmem:[#allocation2] sm:$0x1]  ;;  %v120_v1 = vld [vmem:[%s310_s2] sm:$0x1] }
  0x38   : > { %vm122_vm0 = vcmask 253952   ;;  %v121_v2 = vmul.f32 %v120_v1, %v119_v0  ;;  %vm126_vm1 = vcmask 0  }
  0x3a   : > { %v123_v3 = vsel %vm122_vm0, %v121_v2, 0.0 }
  0x3b   : > { %124 = vadd.xlane.f32.xlu0 %v123_v3 }
  0xc8   : > { %v125_v4 = vpop.xlane.xlu0 %124 }
  0xc9   : > { %127 = vst.msk [vmem:[%s98_s25] sm:$0x1] %vm126_vm1, %v125_v4 }
  0xca PF: > { %s17_s22 = sadd.s32 1, %s236_s22  }
  0xcb   : > { %p14_p5 = scmp.ge.s32.totalorder %s17_s22, 4  }
  0xcd   :  { %16 = sbr.rel (!%p14_p5) target bundleno = 13 (0xd), region = 56 }
  0xd4   :  { %145 = vsyncmov [#allocation3] }
  0xd7   :  { %s146_s19 = vpop.sfrf %145 }
  0xd8   :  { %p181_p6 = scmp.ne.s32.totalorder %s146_s19, 0 }
  0xda   :  { %150 = shalt.err (%p181_p6)  }

</bundles_post_ra>
